<compile_context>
chip_gen: v5e
topology: v5e:2x2
jax: 0.10.0
libtpu: 0.0.40
codegen_flags: <defaults>
</compile_context>

<pallas_src>
import functools

import jax
import jax.numpy as jnp
from jax.experimental import pallas as pl
from jax.experimental.pallas import tpu as pltpu


def _round_up(x, m):
    return (x + m - 1) // m * m


# ----------------------------------------------------------------------------
# In-kernel helpers
# ----------------------------------------------------------------------------
def _normalized_sim(q_ref, k_ref):
    """cos_sim = normalize(q, dim=1) @ normalize(K, dim=1)^T  (f32, MXU + EUP)."""
    q = q_ref[...].astype(jnp.float32)                 # (TB, key_d)
    k = k_ref[...].astype(jnp.float32)                 # (pool, key_d)
    k_inv = jax.lax.rsqrt(jnp.maximum(jnp.sum(k * k, axis=1, keepdims=True), 1e-24))
    q_inv = jax.lax.rsqrt(jnp.maximum(jnp.sum(q * q, axis=1, keepdims=True), 1e-24))
    kn = k * k_inv
    s = jax.lax.dot_general(                           # 'bj,kj->bk' (no XLU transpose)
        q, kn,
        dimension_numbers=(((1,), (1,)), ((), ())),
        preferred_element_type=jnp.float32,
    )                                                  # (TB, pool)
    return s * q_inv


def _unnormalized_score(q_ref, k_ref):
    """q @ normalize(K)^T — argmax over pool identical to cos_sim (q scale > 0)."""
    q = q_ref[...].astype(jnp.float32)
    k = k_ref[...].astype(jnp.float32)
    k_inv = jax.lax.rsqrt(jnp.maximum(jnp.sum(k * k, axis=1, keepdims=True), 1e-24))
    kn = k * k_inv
    return jax.lax.dot_general(
        q, kn,
        dimension_numbers=(((1,), (1,)), ((), ())),
        preferred_element_type=jnp.float32,
    )


def _row_argmax_onehot(s):
    """One-hot of per-row argmax with first-index tie-break (matches torch.topk)."""
    b, p = s.shape
    lane = jax.lax.broadcasted_iota(jnp.int32, (b, p), 1)
    row_max = jnp.max(s, axis=1, keepdims=True)
    idx = jnp.min(jnp.where(s == row_max, lane, p), axis=1, keepdims=True)
    return (lane == idx).astype(jnp.float32)


def _gather_halves(onehot_f32, pk_ref, pv_ref, ek_ref, ev_ref):
    """Data-dependent prompt gather as two lane-dense MXU matmuls."""
    oh = onehot_f32.astype(pk_ref.dtype)
    ek = jnp.dot(oh, pk_ref[...], preferred_element_type=jnp.float32)
    ev = jnp.dot(oh, pv_ref[...], preferred_element_type=jnp.float32)
    ek_ref[...] = ek.astype(ek_ref.dtype)
    ev_ref[...] = ev.astype(ev_ref.dtype)


# ----------------------------------------------------------------------------
# Kernels
# ----------------------------------------------------------------------------
def _select_train_kernel(q_ref, k_ref, pk_ref, pv_ref, cos_ref, ek_ref, ev_ref):
    cos = _normalized_sim(q_ref, k_ref)                # (TB, pool) f32
    cos_ref[...] = cos
    _gather_halves(_row_argmax_onehot(cos), pk_ref, pv_ref, ek_ref, ev_ref)


def _select_eval_kernel(q_ref, k_ref, pk_ref, pv_ref, ek_ref, ev_ref):
    # Selection only: skip q normalization and skip storing cos entirely.
    s = _unnormalized_score(q_ref, k_ref)
    _gather_halves(_row_argmax_onehot(s), pk_ref, pv_ref, ek_ref, ev_ref)


def _bootstrap_loss_kernel(b_actual, tb, tid_ref, q_ref, k_ref, loss_ref):
    """loss = sum_b (1 - cos_sim[b, task_id]); accumulated across batch tiles."""
    @pl.when(pl.program_id(0) == 0)
    def _():
        loss_ref[...] = jnp.zeros_like(loss_ref)

    cos = _normalized_sim(q_ref, k_ref)                # (TB, pool)
    rows = pl.program_id(0) * tb + jax.lax.broadcasted_iota(jnp.int32, cos.shape, 0)
    lanes = jax.lax.broadcasted_iota(jnp.int32, cos.shape, 1)
    mask = jnp.logical_and(rows < b_actual, lanes == tid_ref[0]).astype(jnp.float32)
    loss_ref[...] += jnp.sum((1.0 - cos) * mask)


# ----------------------------------------------------------------------------
# Wrappers
# ----------------------------------------------------------------------------
def _select_prompts(q, K, p, *, with_cos, block_b=128):
    """Fused cos-sim/argmax/gather.  Returns (cos?, Ek, Ev) with Ek/Ev (B, L/2, D)."""
    B, key_d = q.shape
    pool, L, D = p.shape
    half_len = L // 2
    half = half_len * D
    half_pad = _round_up(half, 128)                    # lane-dense stores

    p_k = p[:, :half_len, :].reshape(pool, half)
    p_v = p[:, half_len:, :].reshape(pool, half)
    if half_pad != half:
        p_k = jnp.pad(p_k, ((0, 0), (0, half_pad - half)))
        p_v = jnp.pad(p_v, ((0, 0), (0, half_pad - half)))

    TB = min(block_b, _round_up(B, 8))                 # sublane-aligned batch tile
    Bp = _round_up(B, TB)
    q_pad = jnp.pad(q, ((0, Bp - B), (0, 0))) if Bp != B else q

    grid = (Bp // TB,)
    in_specs = [
        pl.BlockSpec((TB, key_d), lambda i: (i, 0)),       # q tile
        pl.BlockSpec((pool, key_d), lambda i: (0, 0)),     # K   (resident)
        pl.BlockSpec((pool, half_pad), lambda i: (0, 0)),  # p_k (resident)
        pl.BlockSpec((pool, half_pad), lambda i: (0, 0)),  # p_v (resident)
    ]
    ek_spec = pl.BlockSpec((TB, half_pad), lambda i: (i, 0))
    ev_spec = pl.BlockSpec((TB, half_pad), lambda i: (i, 0))

    if with_cos:
        kernel = _select_train_kernel
        out_shape = (
            jax.ShapeDtypeStruct((Bp, pool), jnp.float32),
            jax.ShapeDtypeStruct((Bp, half_pad), p.dtype),
            jax.ShapeDtypeStruct((Bp, half_pad), p.dtype),
        )
        out_specs = [pl.BlockSpec((TB, pool), lambda i: (i, 0)), ek_spec, ev_spec]
    else:
        kernel = _select_eval_kernel
        out_shape = (
            jax.ShapeDtypeStruct((Bp, half_pad), p.dtype),
            jax.ShapeDtypeStruct((Bp, half_pad), p.dtype),
        )
        out_specs = [ek_spec, ev_spec]

    res = pl.pallas_call(
        kernel,
        out_shape=out_shape,
        grid_spec=pltpu.PrefetchScalarGridSpec(
            num_scalar_prefetch=0,
            grid=grid,
            in_specs=in_specs,
            out_specs=out_specs,
        ),
        compiler_params=pltpu.CompilerParams(dimension_semantics=("parallel",)),
    )(q_pad, K, p_k, p_v)

    if with_cos:
        cos, ek, ev = res
        cos = cos[:B] if Bp != B else cos
    else:
        ek, ev = res
        cos = None

    if Bp != B or half_pad != half:
        ek = ek[:B, :half]
        ev = ev[:B, :half]
    ek = ek.reshape(B, half_len, D)
    ev = ev.reshape(B, half_len, D)
    return cos, ek, ev


def select_prompts_train(q, K, p, *, block_b=128):
    return _select_prompts(q, K, p, with_cos=True, block_b=block_b)


def select_prompts_eval(q, K, p, *, block_b=128):
    _, ek, ev = _select_prompts(q, K, p, with_cos=False, block_b=block_b)
    return ek, ev


def bootstrap_loss(q, K, task_id, *, block_b=128):
    """sum(1 - cos_sim[:, task_id]) without materializing cos_sim in HBM."""
    B, key_d = q.shape
    pool = K.shape[0]
    TB = min(block_b, _round_up(B, 8))
    Bp = _round_up(B, TB)
    q_pad = jnp.pad(q, ((0, Bp - B), (0, 0))) if Bp != B else q
    tid = jnp.asarray([task_id], dtype=jnp.int32)

    kernel = functools.partial(_bootstrap_loss_kernel, B, TB)
    loss = pl.pallas_call(
        kernel,
        out_shape=jax.ShapeDtypeStruct((1, 1), jnp.float32),
        grid_spec=pltpu.PrefetchScalarGridSpec(
            num_scalar_prefetch=1,
            grid=(Bp // TB,),
            in_specs=[
                pl.BlockSpec((TB, key_d), lambda i, tid_ref: (i, 0)),
                pl.BlockSpec((pool, key_d), lambda i, tid_ref: (0, 0)),
            ],
            out_specs=pl.BlockSpec((1, 1), lambda i, tid_ref: (0, 0)),
        ),
        compiler_params=pltpu.CompilerParams(dimension_semantics=("arbitrary",)),
    )(tid, q_pad, K)
    return loss[0, 0]


# ----------------------------------------------------------------------------
# DualPrompt module (JAX / Pallas)
# ----------------------------------------------------------------------------
class DualPromptPallas:
    def __init__(self, emb_d, n_tasks, prompt_param, key_dim=768, seed=0,
                 param_dtype=jnp.float32, block_b=128):
        self.task_count = 0
        self.emb_d = emb_d
        self.key_d = key_dim
        self.n_tasks = n_tasks
        self.block_b = block_b
        self._init_smart(emb_d, prompt_param)

        # deterministic parameter init (matches tensor_prompt's uniform_[0,1))
        key = jax.random.PRNGKey(seed)
        self.params = {}
        for g in self.g_layers:
            key, sub = jax.random.split(key)
            self.params[f"g_p_{g}"] = jax.random.uniform(
                sub, (self.g_p_length, emb_d), dtype=jnp.float32)
        for e in self.e_layers:
            key, sub_p, sub_k = jax.random.split(key, 3)
            # prompts optionally stored in bf16 (halves HBM traffic of the gather);
            # keys stay f32 (tiny, keeps cos_sim / tie-breaks exact).
            self.params[f"e_p_{e}"] = jax.random.uniform(
                sub_p, (self.e_pool_size, self.e_p_length, emb_d),
                dtype=jnp.float32).astype(param_dtype)
            self.params[f"e_k_{e}"] = jax.random.uniform(
                sub_k, (self.e_pool_size, self.key_d), dtype=jnp.float32)

    def _init_smart(self, emb_d, prompt_param):
        self.top_k = 1
        self.task_id_bootstrap = True
        self.g_layers = [0, 1]
        self.e_layers = [2, 3, 4]
        self.g_p_length = int(prompt_param[2])
        self.e_p_length = int(prompt_param[1])
        self.e_pool_size = int(prompt_param[0])

    def process_task_count(self):
        self.task_count += 1

    def forward(self, x_querry, l, x_block, train=False, task_id=None):
        B = x_querry.shape[0]
        loss = 0

        e_valid = False
        Ek = Ev = None
        if l in self.e_layers:
            e_valid = True
            K = self.params[f"e_k_{l}"]
            p = self.params[f"e_p_{l}"]
            i = self.e_p_length // 2

            if train and self.task_id_bootstrap:
                # loss fused in a tiny Pallas kernel; constant prompt index -> no gather
                loss = bootstrap_loss(x_querry, K, task_id, block_b=self.block_b)
                Ek = jnp.broadcast_to(p[task_id, :i, :][None], (B, i, self.emb_d))
                Ev = jnp.broadcast_to(p[task_id, i:, :][None], (B, i, self.emb_d))
            elif train:
                cos_sim, Ek, Ev = select_prompts_train(
                    x_querry, K, p, block_b=self.block_b)
                # NOTE: reproduces the original PyTorch advanced-indexing quirk for
                # top_k=1: cos_sim[:, k_idx] is a (B, B) gather, so the loss sums
                # B^2 terms (not the B per-row selected similarities).
                k_idx = jnp.argmax(cos_sim, axis=1)
                loss = jnp.sum(1.0 - cos_sim[:, k_idx])
            else:
                # selection-only fused kernel (no cos_sim materialized)
                Ek, Ev = select_prompts_eval(x_querry, K, p, block_b=self.block_b)

        g_valid = False
        Gk = Gv = None
        if l in self.g_layers:
            g_valid = True
            j = self.g_p_length // 2
            gp = self.params[f"g_p_{l}"]
            P_ = jnp.broadcast_to(gp[None, :, :], (B, self.g_p_length, self.emb_d))
            Gk = P_[:, :j, :]
            Gv = P_[:, j:, :]

        if e_valid and g_valid:
            p_return = [jnp.concatenate((Ek, Gk), axis=1),
                        jnp.concatenate((Ev, Gv), axis=1)]
        elif e_valid:
            p_return = [Ek, Ev]
        elif g_valid:
            p_return = [Gk, Gv]
            loss = 0
        else:
            p_return = None
            loss = 0

        if train:
            return p_return, loss, x_block
        else:
            return p_return, 0, x_block


# ----------------------------------------------------------------------------
# Demo / smoke test
# ----------------------------------------------------------------------------
if __name__ == "__main__":
    emb_d = 128
    key_dim = 128
    n_tasks = 4
    e_pool_size = 10
    e_p_length = 8
    g_p_length = 8
    B = 8
    i_half = e_p_length // 2

    module = DualPromptPallas(
        emb_d, n_tasks, prompt_param=[e_pool_size, e_p_length, g_p_length],
        key_dim=key_dim, seed=0)

    key = jax.random.PRNGKey(0)
    kq, kb, kbig = jax.random.split(key, 3)
    x_querry = jax.random.normal(kq, (B, key_dim), dtype=jnp.float32)
    x_block = jax.random.normal(kb, (B, 16, emb_d), dtype=jnp.float32)

    # pure-JAX reference helpers
    def ref_cos(q, K):
        qn = q / jnp.maximum(jnp.linalg.norm(q, axis=1, keepdims=True), 1e-12)
        kn = K / jnp.maximum(jnp.linalg.norm(K, axis=1, keepdims=True), 1e-12)
        return qn @ kn.T

    # --- e-layer, eval path (selection-only fused kernel) ---------------------
    (ek, ev), loss_eval, _ = module.forward(x_querry, l=2, x_block=x_block, train=False)
    jax.block_until_ready(ek); jax.block_until_ready(ev)
    assert ek.shape == (B, i_half, emb_d) and ev.shape == (B, i_half, emb_d)

    K2 = module.params["e_k_2"]; p2 = module.params["e_p_2"]
    cos_ref = ref_cos(x_querry, K2)
    sel_ref = p2[jnp.argmax(cos_ref, axis=1)]
    assert jnp.allclose(ek, sel_ref[:, :i_half], atol=1e-5), "eval Ek mismatch"
    assert jnp.allclose(ev, sel_ref[:, i_half:], atol=1e-5), "eval Ev mismatch"

    # --- e-layer, non-bootstrap train path (cos + gather fused kernel) --------
    module.task_id_bootstrap = False
    (ek_t, ev_t), loss_t, _ = module.forward(x_querry, l=3, x_block=x_block, train=True)
    jax.block_until_ready(ek_t); jax.block_until_ready(loss_t)
    K3 = module.params["e_k_3"]; p3 = module.params["e_p_3"]
    cos3 = ref_cos(x_querry, K3)
    kidx3 = jnp.argmax(cos3, axis=1)
    loss3_ref = jnp.sum(1.0 - cos3[:, kidx3])
    sel3_ref = p3[kidx3]
    assert jnp.allclose(ek_t, sel3_ref[:, :i_half], atol=1e-5), "train Ek mismatch"
    assert jnp.allclose(loss_t, loss3_ref, atol=1e-4), "train loss mismatch"
    module.task_id_bootstrap = True

    # --- e-layer, bootstrap train path (fused scalar-loss kernel) -------------
    (ek_b, ev_b), loss_b, _ = module.forward(
        x_querry, l=4, x_block=x_block, train=True, task_id=1)
    jax.block_until_ready(loss_b)
    K4 = module.params["e_k_4"]
    loss4_ref = jnp.sum(1.0 - ref_cos(x_querry, K4)[:, 1])
    assert jnp.allclose(loss_b, loss4_ref, atol=1e-4), "bootstrap loss mismatch"
    assert ek_b.shape == (B, i_half, emb_d)

    # --- g-layer path ----------------------------------------------------------
    (gk, gv), loss_g, _ = module.forward(x_querry, l=0, x_block=x_block, train=False)
    jax.block_until_ready(gk)
    assert gk.shape == (B, g_p_length // 2, emb_d)
    assert gv.shape == (B, g_p_length // 2, emb_d)

    # --- multi-tile grid path (B=24, TB=8 -> 3 pipelined grid steps) ----------
    q_big = jax.random.normal(kbig, (24, key_dim), dtype=jnp.float32)
    ek_g, ev_g = select_prompts_eval(q_big, K2, p2, block_b=8)
    jax.block_until_ready(ek_g)
    sel_big_ref = p2[jnp.argmax(ref_cos(q_big, K2), axis=1)]
    assert jnp.allclose(ek_g, sel_big_ref[:, :i_half], atol=1e-5), "tiled Ek mismatch"
    assert jnp.allclose(ev_g, sel_big_ref[:, i_half:], atol=1e-5), "tiled Ev mismatch"

    # --- optional bf16 prompt storage (halves gather HBM traffic, bf16 MXU) ----
    module_bf16 = DualPromptPallas(
        emb_d, n_tasks, prompt_param=[e_pool_size, e_p_length, g_p_length],
        key_dim=key_dim, seed=0, param_dtype=jnp.bfloat16)
    (ek16, ev16), _, _ = module_bf16.forward(x_querry, l=2, x_block=x_block, train=False)
    jax.block_until_ready(ek16)
    p2_bf = module_bf16.params["e_p_2"]
    K2_bf = module_bf16.params["e_k_2"]
    sel_bf_ref = p2_bf[jnp.argmax(ref_cos(x_querry, K2_bf), axis=1)]
    assert ek16.dtype == jnp.bfloat16
    assert jnp.allclose(ek16.astype(jnp.float32),
                        sel_bf_ref[:, :i_half].astype(jnp.float32), atol=1e-2), \
        "bf16 Ek mismatch"

    print("KERNEL_OK")
</pallas_src>

<mosaic_0001>
module attributes {stable_mosaic.version = 11 : i64} {
  func.func @_select_eval_kernel(%arg0: i32, %arg1: memref<8x128xf32, #tpu.memory_space<vmem>>, %arg2: memref<10x128xf32, #tpu.memory_space<vmem>>, %arg3: memref<10x512xf32, #tpu.memory_space<vmem>>, %arg4: memref<10x512xf32, #tpu.memory_space<vmem>>, %arg5: memref<8x512xf32, #tpu.memory_space<vmem>>, %arg6: memref<8x512xf32, #tpu.memory_space<vmem>>) attributes {dimension_semantics = [#tpu.dimension_semantics<parallel>], iteration_bounds = array<i64: 1>, scalar_prefetch = 0 : i64, scratch_operands = 0 : i64, tpu.core_type = #tpu.core_type<tc>, window_params = [{transform_indices = @transform_0, window_bounds = array<i64: 8, 128>}, {pipeline_mode = #tpu.pipeline_mode<synchronous>, transform_indices = @transform_1, window_bounds = array<i64: 10, 128>}, {pipeline_mode = #tpu.pipeline_mode<synchronous>, transform_indices = @transform_2, window_bounds = array<i64: 10, 512>}, {pipeline_mode = #tpu.pipeline_mode<synchronous>, transform_indices = @transform_3, window_bounds = array<i64: 10, 512>}, {transform_indices = @transform_4, window_bounds = array<i64: 8, 512>}, {transform_indices = @transform_5, window_bounds = array<i64: 8, 512>}]} {
    %c0 = arith.constant 0 : index
    %c0_0 = arith.constant 0 : index
    %0 = vector.load %arg1[%c0, %c0_0] : memref<8x128xf32, #tpu.memory_space<vmem>>, vector<8x128xf32>
    %c0_1 = arith.constant 0 : index
    %c0_2 = arith.constant 0 : index
    %1 = vector.load %arg2[%c0_1, %c0_2] : memref<10x128xf32, #tpu.memory_space<vmem>>, vector<10x128xf32>
    %2 = arith.mulf %1, %1 : vector<10x128xf32>
    %cst = arith.constant dense<0.000000e+00> : vector<10xf32>
    %3 = vector.multi_reduction <add>, %2, %cst [1] : vector<10x128xf32> to vector<10xf32>
    %4 = vector.shape_cast %3 : vector<10xf32> to vector<10x1xf32>
    %cst_3 = arith.constant 1.000000e-24 : f32
    %5 = vector.broadcast %cst_3 : f32 to vector<10x1xf32>
    %6 = arith.maximumf %4, %5 : vector<10x1xf32>
    %7 = math.rsqrt %6 : vector<10x1xf32>
    %8 = vector.broadcast %7 : vector<10x1xf32> to vector<10x128xf32>
    %9 = arith.mulf %1, %8 : vector<10x128xf32>
    %cst_4 = arith.constant dense<0.000000e+00> : vector<8x10xf32>
    %10 = tpu.matmul %0, %9, %cst_4 {dimension_numbers = #tpu.dot_dimension_numbers<[1], [1], [0], [0], [0, 0, 1, 0], [], []>} : vector<8x128xf32>, vector<10x128xf32>, vector<8x10xf32> -> vector<8x10xf32>
    %11 = tpu.iota {dimensions = array<i32: 1>} : vector<8x10xi32>
    %cst_5 = arith.constant dense<0xFF800000> : vector<8xf32>
    %12 = vector.multi_reduction <maximumf>, %10, %cst_5 [1] : vector<8x10xf32> to vector<8xf32>
    %13 = vector.shape_cast %12 : vector<8xf32> to vector<8x1xf32>
    %14 = vector.broadcast %13 : vector<8x1xf32> to vector<8x10xf32>
    %15 = arith.cmpf oeq, %10, %14 : vector<8x10xf32>
    %c10_i32 = arith.constant 10 : i32
    %16 = vector.broadcast %c10_i32 : i32 to vector<8x10xi32>
    %17 = arith.select %15, %11, %16 : vector<8x10xi1>, vector<8x10xi32>
    %cst_6 = arith.constant dense<2147483647> : vector<8xi32>
    %18 = vector.multi_reduction <minsi>, %17, %cst_6 [1] : vector<8x10xi32> to vector<8xi32>
    %19 = vector.shape_cast %18 : vector<8xi32> to vector<8x1xi32>
    %20 = vector.broadcast %19 : vector<8x1xi32> to vector<8x10xi32>
    %21 = arith.cmpi eq, %11, %20 : vector<8x10xi32>
    %22 = arith.extui %21 : vector<8x10xi1> to vector<8x10xi32>
    %23 = arith.sitofp %22 : vector<8x10xi32> to vector<8x10xf32>
    %c0_7 = arith.constant 0 : index
    %c0_8 = arith.constant 0 : index
    %24 = vector.load %arg3[%c0_7, %c0_8] : memref<10x512xf32, #tpu.memory_space<vmem>>, vector<10x512xf32>
    %cst_9 = arith.constant dense<0.000000e+00> : vector<8x512xf32>
    %25 = tpu.matmul %23, %24, %cst_9 {dimension_numbers = #tpu.dot_dimension_numbers<[1], [0], [0], [1], [0, 0, 1, 1], [], []>} : vector<8x10xf32>, vector<10x512xf32>, vector<8x512xf32> -> vector<8x512xf32>
    %c0_10 = arith.constant 0 : index
    %c0_11 = arith.constant 0 : index
    %26 = vector.load %arg4[%c0_10, %c0_11] : memref<10x512xf32, #tpu.memory_space<vmem>>, vector<10x512xf32>
    %cst_12 = arith.constant dense<0.000000e+00> : vector<8x512xf32>
    %27 = tpu.matmul %23, %26, %cst_12 {dimension_numbers = #tpu.dot_dimension_numbers<[1], [0], [0], [1], [0, 0, 1, 1], [], []>} : vector<8x10xf32>, vector<10x512xf32>, vector<8x512xf32> -> vector<8x512xf32>
    %c0_13 = arith.constant 0 : index
    %c0_14 = arith.constant 0 : index
    %28 = vector.load %arg5[%c0_13, %c0_14] : memref<8x512xf32, #tpu.memory_space<vmem>>, vector<8x512xf32>
    tpu.vector_store %arg5[%c0_13, %c0_14], %25 {strides = array<i32>} : memref<8x512xf32, #tpu.memory_space<vmem>>, vector<8x512xf32>,
    %c0_15 = arith.constant 0 : index
    %c0_16 = arith.constant 0 : index
    %29 = vector.load %arg6[%c0_15, %c0_16] : memref<8x512xf32, #tpu.memory_space<vmem>>, vector<8x512xf32>
    tpu.vector_store %arg6[%c0_15, %c0_16], %27 {strides = array<i32>} : memref<8x512xf32, #tpu.memory_space<vmem>>, vector<8x512xf32>,
    return
  }
  func.func @transform_0(%arg0: i32) -> (i32, i32) {
    %c0_i32 = arith.constant 0 : i32
    %c0_i32_0 = arith.constant 0 : i32
    return %arg0, %c0_i32 : i32, i32
  }
  func.func @transform_1(%arg0: i32) -> (i32, i32) {
    %c0_i32 = arith.constant 0 : i32
    %c0_i32_0 = arith.constant 0 : i32
    %c0_i32_1 = arith.constant 0 : i32
    return %c0_i32, %c0_i32_0 : i32, i32
  }
  func.func @transform_2(%arg0: i32) -> (i32, i32) {
    %c0_i32 = arith.constant 0 : i32
    %c0_i32_0 = arith.constant 0 : i32
    %c0_i32_1 = arith.constant 0 : i32
    return %c0_i32, %c0_i32_0 : i32, i32
  }
  func.func @transform_3(%arg0: i32) -> (i32, i32) {
    %c0_i32 = arith.constant 0 : i32
    %c0_i32_0 = arith.constant 0 : i32
    %c0_i32_1 = arith.constant 0 : i32
    return %c0_i32, %c0_i32_0 : i32, i32
  }
  func.func @transform_4(%arg0: i32) -> (i32, i32) {
    %c0_i32 = arith.constant 0 : i32
    %c0_i32_0 = arith.constant 0 : i32
    return %arg0, %c0_i32 : i32, i32
  }
  func.func @transform_5(%arg0: i32) -> (i32, i32) {
    %c0_i32 = arith.constant 0 : i32
    %c0_i32_0 = arith.constant 0 : i32
    return %arg0, %c0_i32 : i32, i32
  }
}

</mosaic_0001>

<bundles_post_ra>
// kernel: tpu_custom_call.1
= control target key start
LH: loop header
LB: loop body
LE: loop exit
PB: predicated region body
PF: predicated region fallthrough
CT: control target
= control target key end

     0   :  { %11 = vsyncpa [#allocation3], 0  ;;  %s673_s0 = inlined_call_operand.hbm [shape: f32[8,128], index: 0, kind: input, shape index: {}]   ;;  %s674_s1 = inlined_call_operand.hbm [shape: f32[10,128], index: 1, kind: input, shape index: {}]   ;;  %s675_s2 = inlined_call_operand.hbm [shape: f32[10,512], index: 2, kind: input, shape index: {}]   ;;  %s676_s3 = inlined_call_operand.hbm [shape: f32[10,512], index: 3, kind: input, shape index: {}]   ;;  %s677_s4 = inlined_call_operand.hbm [shape: f32[8,512], index: 4, kind: output, shape index: {0}]   ;;  %s678_s5 = inlined_call_operand.hbm [shape: f32[8,512], index: 5, kind: output, shape index: {1}]  }
   0x1   :  { %12 = vsyncpa [#allocation6], 0 }
   0x2   :  { %13 = vsyncpa [#allocation9], 0 }
   0x3   :  { %14 = vsyncpa [#allocation4], 0  ;;  %s31_s20 = sshll.u32 %s674_s1, 4  ;;  %s32_s20 = int_to_ptr.hbm [resolvable:$true] %s31_s20 }
   0x4   :  { %15 = vsyncpa [#allocation12], 0  ;;  %s595_s21 = smov [#allocation5]   ;;  %s21_s25 = sshll.u32 %s673_s0, 4  ;;  %s22_s25 = int_to_ptr.hbm [resolvable:$true] %s21_s25 }
   0x5   :  { %s33_s22 = sshll.u32 %s595_s21, 4  ;;  %s596_s26 = smov 128   ;;  %s34_s22 = int_to_ptr.vmem [resolvable:$true] %s33_s22 }
   0x6   :  { %s597_s27 = smov 8   ;;  %s598_s28 = smov [#allocation2]  }
   0x7   :  { %39 = dma.hbm_to_vmem [thread:$0]  %s32_s20, 256, %s34_s22, [#allocation6], %s596_s26, %s596_s26, %s597_s27  }
   0x8   :  { %s23_s29 = sshll.u32 %s598_s28, 4  ;;  %s44_s7 = sshll.u32 %s675_s2, 4  ;;  %s24_s29 = int_to_ptr.vmem [resolvable:$true] %s23_s29  ;;  %s45_s7 = int_to_ptr.hbm [resolvable:$true] %s44_s7 }
   0x9   :  { %26 = dma.hbm_to_vmem [thread:$0]  %s22_s25, 128, %s24_s29, [#allocation3]  }
   0xa   :  { %s599_s1 = smov [#allocation7]   ;;  %s57_s0 = sshll.u32 %s676_s3, 4  ;;  %s58_s0 = int_to_ptr.hbm [resolvable:$true] %s57_s0 }
   0xb   :  { %s46_s8 = sshll.u32 %s599_s1, 4  ;;  %s600_s11 = smov 512   ;;  %s47_s8 = int_to_ptr.vmem [resolvable:$true] %s46_s8 }
   0xc   :  { %s601_s12 = smov 32   ;;  %s602_s13 = smov [#allocation8]  }
   0xd   :  { %52 = dma.hbm_to_vmem [thread:$0]  %s45_s7, 1024, %s47_s8, [#allocation6], %s600_s11, %s600_s11, %s601_s12  }
   0xe   :  { %s59_s14 = sshll.u32 %s602_s13, 4  ;;  %s60_s14 = int_to_ptr.vmem [resolvable:$true] %s59_s14 }
   0xf   :  { %65 = dma.hbm_to_vmem [thread:$0]  %s58_s0, 1024, %s60_s14, [#allocation9], %s600_s11, %s600_s11, %s601_s12  }
  0x10   :  { %585 = dma.done.wait [#allocation3], 128  }
  0x11   :  { %586 = vsyncadd [#allocation3], 4294967168 }
  0x12   :  { %587 = dma.done.wait [#allocation6], 1280  }
  0x13   :  { %588 = vsyncadd [#allocation6], 4294966016 }
  0x14   :  { %589 = dma.done.wait [#allocation9], 1024  }
  0x15   :  { %590 = vsyncadd [#allocation9], 4294966272  ;;  %v84_v0 = vld [vmem:[#allocation5 + $0x8] sm:$0x3]  ;;  %vm89_vm0 = vcmask 1041408   ;;  %v83_v3 = vld [vmem:[#allocation5] sm:$0xff]  ;;  %v137_v28 = vlaneseq }
  0x16   :  { %v86_v1 = vmul.f32 %v84_v0, %v84_v0  ;;  %v85_v4 = vmul.f32 %v83_v3, %v83_v3  ;;  %v82_v25 = vld [vmem:[#allocation2] sm:$0xff]  ;;  %vm139_vm7 = vcmask 80896   ;;  %v167_v39 = vld [vmem:[#allocation7 + $0x20] sm:$0x3]  ;;  %v169_v41 = vld [vmem:[#allocation7 + $0x30] sm:$0x3] }
  0x17   :  { %v138_v29 = vand.u32 127, %v137_v28  ;;  %v168_v40 = vld [vmem:[#allocation7 + $0x28] sm:$0x3]  ;;  %410 = vmatpush.msk.msra.mxu1 %vm89_vm0, %v167_v39  ;;  %v272_v42 = vld [vmem:[#allocation8 + $0x30] sm:$0x3]  ;;  %414 = vmatpush.msk.msra.mxu3 %vm89_vm0, %v169_v41  ;;  %v163_v43 = vld [vmem:[#allocation7] sm:$0xff] }
  0x18   :  { %v90_v2 = vsel %vm89_vm0, %v86_v1, 0.0  ;;  %412 = vmatpush.msk.msra.mxu2 %vm89_vm0, %v168_v40  ;;  %v164_v44 = vld [vmem:[#allocation7 + $0x8] sm:$0xff]  ;;  %v165_v45 = vld [vmem:[#allocation7 + $0x10] sm:$0xff]  ;;  %v170_v47 = vld [vmem:[#allocation7 + $0x38] sm:$0x3]  ;;  %v603_v58 = vmov 0.0  }
  0x19   :  { %91 = vadd.xlane.f32.xlu0 %v90_v2  ;;  %201 = vmatpush.msra.mxu1 %v163_v43  ;;  %v268_v46 = vld [vmem:[#allocation8 + $0x10] sm:$0xff]  ;;  %v270_v48 = vld [vmem:[#allocation8 + $0x20] sm:$0x3]  ;;  %v271_v49 = vld [vmem:[#allocation8 + $0x28] sm:$0x3]  ;;  %s604_s2 = smov [#allocation10]  }
  0x1a   :  { %221 = vmatpush.msra.mxu2 %v164_v44  ;;  %241 = vmatpush.msra.mxu3 %v165_v45  ;;  %v166_v50 = vld [vmem:[#allocation7 + $0x18] sm:$0xff]  ;;  %v266_v51 = vld [vmem:[#allocation8] sm:$0xff]  ;;  %v267_v52 = vld [vmem:[#allocation8 + $0x8] sm:$0xff]  ;;  %s379_s3 = sshll.u32 %s604_s2, 4  ;;  %s381_s17 = sshll.u32 %s677_s4, 4  ;;  %s380_s3 = int_to_ptr.vmem [resolvable:$true] %s379_s3  ;;  %s382_s17 = int_to_ptr.hbm [resolvable:$true] %s381_s17 }
  0x1b   :  { %416 = vmatpush.msk.msrb.mxu1 %vm89_vm0, %v170_v47  ;;  %v273_v60 = vld [vmem:[#allocation8 + $0x38] sm:$0x3]  ;;  %s605_s18 = smov [#allocation11]   ;;  %s392_s22 = sshll.u32 %s678_s5, 4  ;;  %s393_s22 = int_to_ptr.hbm [resolvable:$true] %s392_s22 }
  0x1c   :  { %418 = vmatpush.msk.msrb.mxu2 %vm89_vm0, %v270_v48  ;;  %420 = vmatpush.msk.msrb.mxu3 %vm89_vm0, %v271_v49  ;;  %v269_v61 = vld [vmem:[#allocation8 + $0x18] sm:$0xff]  ;;  %s390_s19 = sshll.u32 %s605_s18, 4  ;;  %s391_s19 = int_to_ptr.vmem [resolvable:$true] %s390_s19 }
  0x1d   :  { %261 = vmatpush.msrb.mxu1 %v166_v50 }
  0x1e   :  { %301 = vmatpush.msrb.mxu2 %v266_v51  ;;  %321 = vmatpush.msrb.mxu3 %v267_v52 }
  0x21   :  { %87 = vadd.xlane.f32.xlu0 %v85_v4 }
  0x8c   :  { %v92_v5 = vpop.xlane.xlu0 %91 }
  0x8d   :  { %v94_v6 = vmax.f32 %v92_v5, 1e-24 }
  0x8f   :  { %437 = vrsqrt.f32 %v94_v6  ;;  %vm111_vm2 = vweird.f32 %v94_v6 }
  0x94   :  { %v88_v7 = vpop.xlane.xlu0 %87 }
  0x95   :  { %v438_v8 = vpop.eup %437  ;;  %v93_v9 = vmax.f32 %v88_v7, 1e-24 }
  0x96   :  { %v106_v10 = vmul.f32 %v438_v8, %v94_v6  ;;  %vm112_vm1 = vweird.f32 %v438_v8 }
  0x97   :  { %439 = vrsqrt.f32 %v93_v9  ;;  %vm113_vm3 = vmor %vm111_vm2, %vm112_vm1  ;;  %vm101_vm5 = vweird.f32 %v93_v9 }
  0x98   :  { %v107_v11 = vmul.f32 %v438_v8, %v106_v10 }
  0x9a   :  { %v108_v12 = vmul.f32 0.5, %v107_v11 }
  0x9c   :  { %v109_v13 = vsub.f32 1.5, %v108_v12 }
  0x9d   :  { %v440_v14 = vpop.eup %439 }
  0x9e   :  { %v96_v15 = vmul.f32 %v440_v14, %v93_v9  ;;  %v110_v16 = vmul.f32 %v438_v8, %v109_v13  ;;  %vm102_vm4 = vweird.f32 %v440_v14 }
  0x9f   :  { %vm103_vm6 = vmor %vm101_vm5, %vm102_vm4 }
  0xa0   :  { %v97_v17 = vmul.f32 %v440_v14, %v96_v15  ;;  %v114_v18 = vsel %vm113_vm3, %v438_v8, %v110_v16 }
  0xa1   :  { %v116_v19 = vmul.f32 %v114_v18, %v84_v0 }
  0xa2   :  { %v98_v20 = vmul.f32 0.5, %v97_v17 }
  0xa3   :  { %131 = vmatpush.xpose.msra.mxu0 %v116_v19 }
  0xa4   :  { %v99_v21 = vsub.f32 1.5, %v98_v20 }
  0xa6   :  { %v100_v22 = vmul.f32 %v440_v14, %v99_v21 }
  0xa8   :  { %v104_v23 = vsel %vm103_vm6, %v440_v14, %v100_v22 }
  0xa9   :  { %v115_v24 = vmul.f32 %v104_v23, %v83_v3 }
  0xab   :  { %132 = vmatpush.xpose.msra.mxu0 %v115_v24 }
  0xae   :  { %133 = vmatmul.f32.vlgmr.msra.gmra.mxu0 %v82_v25 }
  0xaf   :  { %422 = vmatpush.msk.msrb.mxu0 %vm89_vm0, %v272_v42 }
  0xb1   :  { %341 = vmatpush.msrb.mxu0 %v268_v46 }
 0x12b   :  { %v134_v26 = vpop.f32.mrf.mxu0 }
 0x12c   :  { %v140_v27 = vsel %vm139_vm7, %v134_v26, -inf }
 0x12d   :  { %141 = vmax.xlane.f32.xlu1 %v140_v27 }
 0x1a0   :  { %v142_v30 = vpop.xlane.xlu1 %141 }
 0x1a1   :  { %vm143_vm8 = vcmp.eq.f32.partialorder %v134_v26, %v142_v30 }
 0x1a2   :  { %v144_v31 = vsel %vm143_vm8, %v138_v29, 10 }
 0x1a3   :  { %v145_v32 = vsel %vm139_vm7, %v144_v31, 2147483647 }
 0x1a4   :  { %v147_v33 = vshra.s32 %v145_v32, 16  ;;  %v146_v35 = vand.u32 65535, %v145_v32 }
 0x1a6   :  { %v149_v34 = vcvt.s32.f32 %v147_v33  ;;  %v148_v37 = vcvt.s32.f32 %v146_v35 }
 0x1a8   :  { %150 = vmin.xlane.f32.xlu1 %v149_v34 }
 0x21b   :  { %v151_v36 = vpop.xlane.xlu1 %150 }
 0x21c   :  { %vm152_vm9 = vcmp.eq.f32.partialorder %v149_v34, %v151_v36  ;;  %v157_v53 = vcvt.f32.s32 %v151_v36 }
 0x21d   :  { %v153_v38 = vsel %vm152_vm9, %v148_v37, inf }
 0x21e   :  { %154 = vmin.xlane.f32.xlu2 %v153_v38  ;;  %v158_v55 = vshll.u32 %v157_v53, 16 }
 0x291   :  { %v155_v54 = vpop.xlane.xlu2 %154 }
 0x292   :  { %v156_v56 = vcvt.f32.s32 %v155_v54 }
 0x294   :  { %v159_v57 = vadd.s32 %v158_v55, %v156_v56 }
 0x296   :  { %vm160_vm10 = vcmp.eq.s32.totalorder %v138_v29, %v159_v57 }
 0x297   :  { %v409_v59 = vsel %vm160_vm10, 1.0, %v603_v58 }
 0x298   :  { %411 = vmatmul.msk.f32.vlgmr.msra.gmra.mxu1 %vm139_vm7, %v409_v59  ;;  %413 = vmatmul.msk.f32.vlgmr.msra.gmra.mxu2 %vm139_vm7, %v409_v59 }
 0x299   :  { %415 = vmatmul.msk.f32.vlgmr.msra.gmra.mxu3 %vm139_vm7, %v409_v59  ;;  %423 = vmatmul.msk.f32.vlgmr.msrb.gmra.mxu0 %vm139_vm7, %v409_v59 }
 0x29a   :  { %424 = vmatpush.msk.msra.mxu1 %vm89_vm0, %v273_v60 }
 0x29c   :  { %361 = vmatpush.msra.mxu1 %v269_v61 }
 0x2a0   :  { %417 = vmatmul.msk.f32.vlgmr.msrb.gmra.mxu1 %vm139_vm7, %v409_v59  ;;  %419 = vmatmul.msk.f32.vlgmr.msrb.gmra.mxu2 %vm139_vm7, %v409_v59 }
 0x2a1   :  { %421 = vmatmul.msk.f32.vlgmr.msrb.gmra.mxu3 %vm139_vm7, %v409_v59 }
 0x2a8   :  { %425 = vmatmul.msk.f32.vlgmr.msra.gmra.mxu1 %vm139_vm7, %v409_v59 }
 0x315   :  { %v203_v62 = vpop.f32.mrf.mxu1 }
 0x316   :  { %366 = vst [vmem:[#allocation10] sm:$0xff] %v203_v62  ;;  %v343_v63 = vpop.f32.mrf.mxu0 }
 0x317   :  { %372 = vst [vmem:[#allocation11 + $0x10] sm:$0xff] %v343_v63 }
 0x31b   :  { %v223_v0 = vpop.f32.mrf.mxu2 }
 0x31c   :  { %367 = vst [vmem:[#allocation10 + $0x8] sm:$0xff] %v223_v0  ;;  %v243_v1 = vpop.f32.mrf.mxu3 }
 0x31d   :  { %368 = vst [vmem:[#allocation10 + $0x10] sm:$0xff] %v243_v1  ;;  %v263_v2 = vpop.f32.mrf.mxu1 }
 0x31e   :  { %369 = vst [vmem:[#allocation10 + $0x18] sm:$0xff] %v263_v2 }
 0x31f   :  { %384 = dma.vmem_to_hbm [thread:$0]  %s380_s3, 512, %s382_s17, [#allocation4]  }
 0x323   :  { %v303_v3 = vpop.f32.mrf.mxu2 }
 0x324   :  { %370 = vst [vmem:[#allocation11] sm:$0xff] %v303_v3  ;;  %v323_v4 = vpop.f32.mrf.mxu3 }
 0x325   :  { %371 = vst [vmem:[#allocation11 + $0x8] sm:$0xff] %v323_v4  ;;  %v363_v5 = vpop.f32.mrf.mxu1 }
 0x326   :  { %373 = vst [vmem:[#allocation11 + $0x18] sm:$0xff] %v363_v5 }
 0x327   :  { %395 = dma.vmem_to_hbm [thread:$0]  %s391_s19, 512, %s393_s22, [#allocation12]  }
 0x328   :  { %591 = dma.done.wait [#allocation4], 512  }
 0x329   :  { %592 = vsyncadd [#allocation4], 4294966784 }
 0x32a   :  { %593 = dma.done.wait [#allocation12], 512  }
 0x32b   :  { %594 = vsyncadd [#allocation12], 4294966784 }
 0x32c   :  { %404 = vsyncpa [#allocation3], 1 }
 0x32d   :  { %405 = vsyncpa [#allocation6], 1 }
 0x32e   :  { %406 = vsyncpa [#allocation9], 1 }
 0x32f   :  { %407 = vsyncpa [#allocation4], 1 }
 0x330   :  { %408 = vsyncpa [#allocation12], 1 }

</bundles_post_ra>
